<compile_context>
chip_gen: v6e
topology: v6e:2x2x1
jax: 0.10.0
libtpu: 0.0.40
codegen_flags: <defaults>
</compile_context>

<pallas_src>
import functools

import jax
import jax.numpy as jnp
from jax import lax
from jax.experimental import pallas as pl
from jax.experimental.pallas import tpu as pltpu


def _sobel_rows(sp_tile, tH, W):
    """sp_tile: (tH+2, W+2) zero-padded slab of the channel-summed image.
    Returns |sobel_x| + |sobel_y| of shape (tH, W) (separable form)."""
    top = sp_tile[0:tH, :]          # s(y-1, :)
    mid = sp_tile[1:tH + 1, :]      # s(y,   :)
    bot = sp_tile[2:tH + 2, :]      # s(y+1, :)
    # vertical passes (sublane shifts)
    t1 = top + 2.0 * mid + bot      # smoothing  -> feeds sobel_x
    t2 = top - bot                  # difference -> feeds sobel_y
    # horizontal passes (lane shifts)
    gx = t1[:, 2:W + 2] - t1[:, 0:W]
    gy = t2[:, 0:W] + 2.0 * t2[:, 1:W + 1] + t2[:, 2:W + 2]
    return jnp.abs(gx) + jnp.abs(gy)


def _sobel_kernel_flat(sp_ref, o_ref, *, tH, W, C):
    """sp_ref: (1, H+2, W+2) resident padded channel-sum; o_ref: (1, C, tH*W)."""
    h = pl.program_id(1)
    row0 = pl.multiple_of(h * tH, tH)
    sp_tile = sp_ref[0, pl.ds(row0, tH + 2), :]          # (tH+2, W+2)
    out = _sobel_rows(sp_tile, tH, W)                    # (tH, W)
    # Re-emit the same (tH, W) registers for every output channel into a dense
    # lane-major slab (no broadcast_to temporary, no in-kernel reshape).
    for c in range(C):
        for r in range(tH):
            o_ref[0, c:c + 1, r * W:(r + 1) * W] = out[r:r + 1, :]


def _sobel_kernel_2d(sp_ref, o_ref, *, tH, W, C):
    """sp_ref: (1, H+2, W+2) resident padded channel-sum; o_ref: (1, C, tH, W).
    Used when W % 128 == 0 (rows are already lane-dense)."""
    h = pl.program_id(1)
    row0 = pl.multiple_of(h * tH, tH)
    sp_tile = sp_ref[0, pl.ds(row0, tH + 2), :]          # (tH+2, W+2)
    out = _sobel_rows(sp_tile, tH, W)                    # (tH, W)
    for c in range(C):
        o_ref[0, c, :, :] = out


def _pick_tile_h(H, W, C, flat_out, out_vmem_budget=4 * 1024 * 1024):
    """Largest tH dividing H whose double-buffered output block fits the budget
    and satisfies the TPU (8, 128) block-shape rules for the chosen layout."""
    fallback = H
    for tH in range(H, 0, -1):
        if H % tH:
            continue
        if tH != H:
            if flat_out:
                if (tH * W) % 128:
                    continue
                if C * tH > 512:          # bound the unrolled per-row store loop
                    continue
            elif tH % 8:
                continue
        fallback = tH                      # smallest valid seen so far
        if 2 * C * tH * W * 4 <= out_vmem_budget:
            return tH                      # largest tile under the VMEM budget
    return fallback


def gradient_pallas(x, *, tile_h=None):
    """x: (N, C, H, W) -> (N, C, H, W) float32, |sobel_x| + |sobel_y|."""
    x = x.astype(jnp.float32)
    N, C, H, W = x.shape

    # (1) Channel reduction (plain-JAX glue, HBM roofline): all (o, i) filter
    #     pairs are identical, so conv(x) == conv(sum_C x) broadcast over C.
    s = jnp.sum(x, axis=1)                               # (N, H, W)
    # (2) 1-px zero halo for conv padding=1 on the channel-summed image only
    #     (C times smaller than padding x itself).
    sp = jnp.pad(s, ((0, 0), (1, 1), (1, 1)))            # (N, H+2, W+2)

    flat_out = (W % 128) != 0
    if tile_h is None:
        tH = _pick_tile_h(H, W, C, flat_out)
    else:
        tH = int(tile_h)
        assert H % tH == 0
        if tH != H:
            assert ((tH * W) % 128 == 0) if flat_out else (tH % 8 == 0)
    n_th = H // tH

    # Full padded s per batch element; same block index across the h axis ->
    # stays resident in VMEM while the output tiles stream out.
    in_spec = pl.BlockSpec((1, H + 2, W + 2), lambda n, h: (n, 0, 0))

    if flat_out:
        kernel = functools.partial(_sobel_kernel_flat, tH=tH, W=W, C=C)
        out_shape = jax.ShapeDtypeStruct((N, C, H * W), jnp.float32)
        out_spec = pl.BlockSpec((1, C, tH * W), lambda n, h: (n, 0, h))
    else:
        kernel = functools.partial(_sobel_kernel_2d, tH=tH, W=W, C=C)
        out_shape = jax.ShapeDtypeStruct((N, C, H, W), jnp.float32)
        out_spec = pl.BlockSpec((1, C, tH, W), lambda n, h: (n, 0, h, 0))

    out = pl.pallas_call(
        kernel,
        out_shape=out_shape,
        grid_spec=pltpu.PrefetchScalarGridSpec(
            num_scalar_prefetch=0,
            grid=(N, n_th),
            in_specs=[in_spec],
            out_specs=out_spec,
        ),
        compiler_params=pltpu.CompilerParams(
            dimension_semantics=("parallel", "parallel"),
            vmem_limit_bytes=32 * 1024 * 1024,
        ),
    )(sp)

    return out.reshape(N, C, H, W)


def _gradient_reference(x):
    """Pure-JAX reference replicating the PyTorch conv exactly (NCHW, (O,I,3,3))."""
    x = x.astype(jnp.float32)
    C = x.shape[1]
    kx = jnp.array([[-1.0, 0.0, 1.0], [-2.0, 0.0, 2.0], [-1.0, 0.0, 1.0]], jnp.float32)
    ky = jnp.array([[1.0, 2.0, 1.0], [0.0, 0.0, 0.0], [-1.0, -2.0, -1.0]], jnp.float32)
    wx = jnp.broadcast_to(kx[None, None], (C, C, 3, 3))
    wy = jnp.broadcast_to(ky[None, None], (C, C, 3, 3))
    dn = lax.conv_dimension_numbers(x.shape, wx.shape, ("NCHW", "OIHW", "NCHW"))
    g1 = lax.conv_general_dilated(x, wx, (1, 1), "SAME", dimension_numbers=dn)
    g2 = lax.conv_general_dilated(x, wy, (1, 1), "SAME", dimension_numbers=dn)
    return jnp.abs(g1) + jnp.abs(g2)


if __name__ == "__main__":
    key = jax.random.PRNGKey(0)
    x = jax.random.normal(key, (2, 4, 16, 16), dtype=jnp.float32)
    ref = _gradient_reference(x)

    # Default path (small W -> lane-dense flattened output, single H tile).
    out = jax.block_until_ready(gradient_pallas(x))
    assert out.shape == (2, 4, 16, 16)
    assert jnp.allclose(out, ref, atol=1e-4, rtol=1e-4), float(jnp.max(jnp.abs(out - ref)))

    # Force multiple H tiles to exercise the resident-input / dynamic-row path.
    out_t = jax.block_until_ready(gradient_pallas(x, tile_h=8))
    assert jnp.allclose(out_t, ref, atol=1e-4, rtol=1e-4), float(jnp.max(jnp.abs(out_t - ref)))

    # W % 128 == 0 path (naturally lane-dense (1, C, tH, W) output blocks).
    x2 = jax.random.normal(jax.random.PRNGKey(1), (1, 3, 8, 128), dtype=jnp.float32)
    out2 = jax.block_until_ready(gradient_pallas(x2))
    ref2 = _gradient_reference(x2)
    assert jnp.allclose(out2, ref2, atol=1e-4, rtol=1e-4), float(jnp.max(jnp.abs(out2 - ref2)))

    print("KERNEL_OK")
</pallas_src>

<mosaic_0001>
module attributes {stable_mosaic.version = 11 : i64} {
  func.func @_sobel_kernel_flat(%arg0: i32, %arg1: i32, %arg2: memref<1x18x18xf32, #tpu.memory_space<vmem>>, %arg3: memref<1x4x256xf32, #tpu.memory_space<vmem>>) attributes {dimension_semantics = [#tpu.dimension_semantics<parallel>, #tpu.dimension_semantics<parallel>], iteration_bounds = array<i64: 2, 1>, scalar_prefetch = 0 : i64, scratch_operands = 0 : i64, tpu.core_type = #tpu.core_type<tc>, window_params = [{transform_indices = @transform_0, window_bounds = array<i64: 1, 18, 18>}, {transform_indices = @transform_1, window_bounds = array<i64: 1, 4, 256>}]} {
    %c16_i32 = arith.constant 16 : i32
    %0 = arith.muli %arg1, %c16_i32 : i32
    %1 = tpu.assume_multiple %0, 16 : i32
    %c0 = arith.constant 0 : index
    %2 = arith.index_cast %1 : i32 to index
    %c0_0 = arith.constant 0 : index
    %3 = vector.load %arg2[%c0, %2, %c0_0] : memref<1x18x18xf32, #tpu.memory_space<vmem>>, vector<1x18x18xf32>
    %4 = vector.shape_cast %3 : vector<1x18x18xf32> to vector<18x18xf32>
    %5 = vector.extract_strided_slice %4 {offsets = [0, 0], sizes = [16, 18], strides = [1, 1]} : vector<18x18xf32> to vector<16x18xf32>
    %6 = vector.extract_strided_slice %4 {offsets = [1, 0], sizes = [16, 18], strides = [1, 1]} : vector<18x18xf32> to vector<16x18xf32>
    %7 = vector.extract_strided_slice %4 {offsets = [2, 0], sizes = [16, 18], strides = [1, 1]} : vector<18x18xf32> to vector<16x18xf32>
    %cst = arith.constant 2.000000e+00 : f32
    %8 = vector.broadcast %cst : f32 to vector<16x18xf32>
    %9 = arith.mulf %8, %6 : vector<16x18xf32>
    %10 = arith.addf %5, %9 : vector<16x18xf32>
    %11 = arith.addf %10, %7 : vector<16x18xf32>
    %12 = arith.subf %5, %7 : vector<16x18xf32>
    %13 = vector.extract_strided_slice %11 {offsets = [0, 2], sizes = [16, 16], strides = [1, 1]} : vector<16x18xf32> to vector<16x16xf32>
    %14 = vector.extract_strided_slice %11 {offsets = [0, 0], sizes = [16, 16], strides = [1, 1]} : vector<16x18xf32> to vector<16x16xf32>
    %15 = arith.subf %13, %14 : vector<16x16xf32>
    %16 = vector.extract_strided_slice %12 {offsets = [0, 0], sizes = [16, 16], strides = [1, 1]} : vector<16x18xf32> to vector<16x16xf32>
    %17 = vector.extract_strided_slice %12 {offsets = [0, 1], sizes = [16, 16], strides = [1, 1]} : vector<16x18xf32> to vector<16x16xf32>
    %cst_1 = arith.constant 2.000000e+00 : f32
    %18 = vector.broadcast %cst_1 : f32 to vector<16x16xf32>
    %19 = arith.mulf %18, %17 : vector<16x16xf32>
    %20 = arith.addf %16, %19 : vector<16x16xf32>
    %21 = vector.extract_strided_slice %12 {offsets = [0, 2], sizes = [16, 16], strides = [1, 1]} : vector<16x18xf32> to vector<16x16xf32>
    %22 = arith.addf %20, %21 : vector<16x16xf32>
    %23 = math.absf %15 : vector<16x16xf32>
    %24 = math.absf %22 : vector<16x16xf32>
    %25 = arith.addf %23, %24 : vector<16x16xf32>
    %26 = vector.extract_strided_slice %25 {offsets = [0, 0], sizes = [1, 16], strides = [1, 1]} : vector<16x16xf32> to vector<1x16xf32>
    %c0_2 = arith.constant 0 : index
    %c0_3 = arith.constant 0 : index
    %c0_4 = arith.constant 0 : index
    %27 = vector.load %arg3[%c0_2, %c0_3, %c0_4] : memref<1x4x256xf32, #tpu.memory_space<vmem>>, vector<1x1x16xf32>
    %28 = vector.shape_cast %27 : vector<1x1x16xf32> to vector<1x16xf32>
    %29 = vector.shape_cast %26 : vector<1x16xf32> to vector<1x1x16xf32>
    tpu.vector_store %arg3[%c0_2, %c0_3, %c0_4], %29 {strides = array<i32>} : memref<1x4x256xf32, #tpu.memory_space<vmem>>, vector<1x1x16xf32>,
    %30 = vector.extract_strided_slice %25 {offsets = [1, 0], sizes = [1, 16], strides = [1, 1]} : vector<16x16xf32> to vector<1x16xf32>
    %c0_5 = arith.constant 0 : index
    %c0_6 = arith.constant 0 : index
    %c16 = arith.constant 16 : index
    %31 = vector.load %arg3[%c0_5, %c0_6, %c16] : memref<1x4x256xf32, #tpu.memory_space<vmem>>, vector<1x1x16xf32>
    %32 = vector.shape_cast %31 : vector<1x1x16xf32> to vector<1x16xf32>
    %33 = vector.shape_cast %30 : vector<1x16xf32> to vector<1x1x16xf32>
    tpu.vector_store %arg3[%c0_5, %c0_6, %c16], %33 {strides = array<i32>} : memref<1x4x256xf32, #tpu.memory_space<vmem>>, vector<1x1x16xf32>,
    %34 = vector.extract_strided_slice %25 {offsets = [2, 0], sizes = [1, 16], strides = [1, 1]} : vector<16x16xf32> to vector<1x16xf32>
    %c0_7 = arith.constant 0 : index
    %c0_8 = arith.constant 0 : index
    %c32 = arith.constant 32 : index
    %35 = vector.load %arg3[%c0_7, %c0_8, %c32] : memref<1x4x256xf32, #tpu.memory_space<vmem>>, vector<1x1x16xf32>
    %36 = vector.shape_cast %35 : vector<1x1x16xf32> to vector<1x16xf32>
    %37 = vector.shape_cast %34 : vector<1x16xf32> to vector<1x1x16xf32>
    tpu.vector_store %arg3[%c0_7, %c0_8, %c32], %37 {strides = array<i32>} : memref<1x4x256xf32, #tpu.memory_space<vmem>>, vector<1x1x16xf32>,
    %38 = vector.extract_strided_slice %25 {offsets = [3, 0], sizes = [1, 16], strides = [1, 1]} : vector<16x16xf32> to vector<1x16xf32>
    %c0_9 = arith.constant 0 : index
    %c0_10 = arith.constant 0 : index
    %c48 = arith.constant 48 : index
    %39 = vector.load %arg3[%c0_9, %c0_10, %c48] : memref<1x4x256xf32, #tpu.memory_space<vmem>>, vector<1x1x16xf32>
    %40 = vector.shape_cast %39 : vector<1x1x16xf32> to vector<1x16xf32>
    %41 = vector.shape_cast %38 : vector<1x16xf32> to vector<1x1x16xf32>
    tpu.vector_store %arg3[%c0_9, %c0_10, %c48], %41 {strides = array<i32>} : memref<1x4x256xf32, #tpu.memory_space<vmem>>, vector<1x1x16xf32>,
    %42 = vector.extract_strided_slice %25 {offsets = [4, 0], sizes = [1, 16], strides = [1, 1]} : vector<16x16xf32> to vector<1x16xf32>
    %c0_11 = arith.constant 0 : index
    %c0_12 = arith.constant 0 : index
    %c64 = arith.constant 64 : index
    %43 = vector.load %arg3[%c0_11, %c0_12, %c64] : memref<1x4x256xf32, #tpu.memory_space<vmem>>, vector<1x1x16xf32>
    %44 = vector.shape_cast %43 : vector<1x1x16xf32> to vector<1x16xf32>
    %45 = vector.shape_cast %42 : vector<1x16xf32> to vector<1x1x16xf32>
    tpu.vector_store %arg3[%c0_11, %c0_12, %c64], %45 {strides = array<i32>} : memref<1x4x256xf32, #tpu.memory_space<vmem>>, vector<1x1x16xf32>,
    %46 = vector.extract_strided_slice %25 {offsets = [5, 0], sizes = [1, 16], strides = [1, 1]} : vector<16x16xf32> to vector<1x16xf32>
    %c0_13 = arith.constant 0 : index
    %c0_14 = arith.constant 0 : index
    %c80 = arith.constant 80 : index
    %47 = vector.load %arg3[%c0_13, %c0_14, %c80] : memref<1x4x256xf32, #tpu.memory_space<vmem>>, vector<1x1x16xf32>
    %48 = vector.shape_cast %47 : vector<1x1x16xf32> to vector<1x16xf32>
    %49 = vector.shape_cast %46 : vector<1x16xf32> to vector<1x1x16xf32>
    tpu.vector_store %arg3[%c0_13, %c0_14, %c80], %49 {strides = array<i32>} : memref<1x4x256xf32, #tpu.memory_space<vmem>>, vector<1x1x16xf32>,
    %50 = vector.extract_strided_slice %25 {offsets = [6, 0], sizes = [1, 16], strides = [1, 1]} : vector<16x16xf32> to vector<1x16xf32>
    %c0_15 = arith.constant 0 : index
    %c0_16 = arith.constant 0 : index
    %c96 = arith.constant 96 : index
    %51 = vector.load %arg3[%c0_15, %c0_16, %c96] : memref<1x4x256xf32, #tpu.memory_space<vmem>>, vector<1x1x16xf32>
    %52 = vector.shape_cast %51 : vector<1x1x16xf32> to vector<1x16xf32>
    %53 = vector.shape_cast %50 : vector<1x16xf32> to vector<1x1x16xf32>
    tpu.vector_store %arg3[%c0_15, %c0_16, %c96], %53 {strides = array<i32>} : memref<1x4x256xf32, #tpu.memory_space<vmem>>, vector<1x1x16xf32>,
    %54 = vector.extract_strided_slice %25 {offsets = [7, 0], sizes = [1, 16], strides = [1, 1]} : vector<16x16xf32> to vector<1x16xf32>
    %c0_17 = arith.constant 0 : index
    %c0_18 = arith.constant 0 : index
    %c112 = arith.constant 112 : index
    %55 = vector.load %arg3[%c0_17, %c0_18, %c112] : memref<1x4x256xf32, #tpu.memory_space<vmem>>, vector<1x1x16xf32>
    %56 = vector.shape_cast %55 : vector<1x1x16xf32> to vector<1x16xf32>
    %57 = vector.shape_cast %54 : vector<1x16xf32> to vector<1x1x16xf32>
    tpu.vector_store %arg3[%c0_17, %c0_18, %c112], %57 {strides = array<i32>} : memref<1x4x256xf32, #tpu.memory_space<vmem>>, vector<1x1x16xf32>,
    %58 = vector.extract_strided_slice %25 {offsets = [8, 0], sizes = [1, 16], strides = [1, 1]} : vector<16x16xf32> to vector<1x16xf32>
    %c0_19 = arith.constant 0 : index
    %c0_20 = arith.constant 0 : index
    %c128 = arith.constant 128 : index
    %59 = vector.load %arg3[%c0_19, %c0_20, %c128] : memref<1x4x256xf32, #tpu.memory_space<vmem>>, vector<1x1x16xf32>
    %60 = vector.shape_cast %59 : vector<1x1x16xf32> to vector<1x16xf32>
    %61 = vector.shape_cast %58 : vector<1x16xf32> to vector<1x1x16xf32>
    tpu.vector_store %arg3[%c0_19, %c0_20, %c128], %61 {strides = array<i32>} : memref<1x4x256xf32, #tpu.memory_space<vmem>>, vector<1x1x16xf32>,
    %62 = vector.extract_strided_slice %25 {offsets = [9, 0], sizes = [1, 16], strides = [1, 1]} : vector<16x16xf32> to vector<1x16xf32>
    %c0_21 = arith.constant 0 : index
    %c0_22 = arith.constant 0 : index
    %c144 = arith.constant 144 : index
    %63 = vector.load %arg3[%c0_21, %c0_22, %c144] : memref<1x4x256xf32, #tpu.memory_space<vmem>>, vector<1x1x16xf32>
    %64 = vector.shape_cast %63 : vector<1x1x16xf32> to vector<1x16xf32>
    %65 = vector.shape_cast %62 : vector<1x16xf32> to vector<1x1x16xf32>
    tpu.vector_store %arg3[%c0_21, %c0_22, %c144], %65 {strides = array<i32>} : memref<1x4x256xf32, #tpu.memory_space<vmem>>, vector<1x1x16xf32>,
    %66 = vector.extract_strided_slice %25 {offsets = [10, 0], sizes = [1, 16], strides = [1, 1]} : vector<16x16xf32> to vector<1x16xf32>
    %c0_23 = arith.constant 0 : index
    %c0_24 = arith.constant 0 : index
    %c160 = arith.constant 160 : index
    %67 = vector.load %arg3[%c0_23, %c0_24, %c160] : memref<1x4x256xf32, #tpu.memory_space<vmem>>, vector<1x1x16xf32>
    %68 = vector.shape_cast %67 : vector<1x1x16xf32> to vector<1x16xf32>
    %69 = vector.shape_cast %66 : vector<1x16xf32> to vector<1x1x16xf32>
    tpu.vector_store %arg3[%c0_23, %c0_24, %c160], %69 {strides = array<i32>} : memref<1x4x256xf32, #tpu.memory_space<vmem>>, vector<1x1x16xf32>,
    %70 = vector.extract_strided_slice %25 {offsets = [11, 0], sizes = [1, 16], strides = [1, 1]} : vector<16x16xf32> to vector<1x16xf32>
    %c0_25 = arith.constant 0 : index
    %c0_26 = arith.constant 0 : index
    %c176 = arith.constant 176 : index
    %71 = vector.load %arg3[%c0_25, %c0_26, %c176] : memref<1x4x256xf32, #tpu.memory_space<vmem>>, vector<1x1x16xf32>
    %72 = vector.shape_cast %71 : vector<1x1x16xf32> to vector<1x16xf32>
    %73 = vector.shape_cast %70 : vector<1x16xf32> to vector<1x1x16xf32>
    tpu.vector_store %arg3[%c0_25, %c0_26, %c176], %73 {strides = array<i32>} : memref<1x4x256xf32, #tpu.memory_space<vmem>>, vector<1x1x16xf32>,
    %74 = vector.extract_strided_slice %25 {offsets = [12, 0], sizes = [1, 16], strides = [1, 1]} : vector<16x16xf32> to vector<1x16xf32>
    %c0_27 = arith.constant 0 : index
    %c0_28 = arith.constant 0 : index
    %c192 = arith.constant 192 : index
    %75 = vector.load %arg3[%c0_27, %c0_28, %c192] : memref<1x4x256xf32, #tpu.memory_space<vmem>>, vector<1x1x16xf32>
    %76 = vector.shape_cast %75 : vector<1x1x16xf32> to vector<1x16xf32>
    %77 = vector.shape_cast %74 : vector<1x16xf32> to vector<1x1x16xf32>
    tpu.vector_store %arg3[%c0_27, %c0_28, %c192], %77 {strides = array<i32>} : memref<1x4x256xf32, #tpu.memory_space<vmem>>, vector<1x1x16xf32>,
    %78 = vector.extract_strided_slice %25 {offsets = [13, 0], sizes = [1, 16], strides = [1, 1]} : vector<16x16xf32> to vector<1x16xf32>
    %c0_29 = arith.constant 0 : index
    %c0_30 = arith.constant 0 : index
    %c208 = arith.constant 208 : index
    %79 = vector.load %arg3[%c0_29, %c0_30, %c208] : memref<1x4x256xf32, #tpu.memory_space<vmem>>, vector<1x1x16xf32>
    %80 = vector.shape_cast %79 : vector<1x1x16xf32> to vector<1x16xf32>
    %81 = vector.shape_cast %78 : vector<1x16xf32> to vector<1x1x16xf32>
    tpu.vector_store %arg3[%c0_29, %c0_30, %c208], %81 {strides = array<i32>} : memref<1x4x256xf32, #tpu.memory_space<vmem>>, vector<1x1x16xf32>,
    %82 = vector.extract_strided_slice %25 {offsets = [14, 0], sizes = [1, 16], strides = [1, 1]} : vector<16x16xf32> to vector<1x16xf32>
    %c0_31 = arith.constant 0 : index
    %c0_32 = arith.constant 0 : index
    %c224 = arith.constant 224 : index
    %83 = vector.load %arg3[%c0_31, %c0_32, %c224] : memref<1x4x256xf32, #tpu.memory_space<vmem>>, vector<1x1x16xf32>
    %84 = vector.shape_cast %83 : vector<1x1x16xf32> to vector<1x16xf32>
    %85 = vector.shape_cast %82 : vector<1x16xf32> to vector<1x1x16xf32>
    tpu.vector_store %arg3[%c0_31, %c0_32, %c224], %85 {strides = array<i32>} : memref<1x4x256xf32, #tpu.memory_space<vmem>>, vector<1x1x16xf32>,
    %86 = vector.extract_strided_slice %25 {offsets = [15, 0], sizes = [1, 16], strides = [1, 1]} : vector<16x16xf32> to vector<1x16xf32>
    %c0_33 = arith.constant 0 : index
    %c0_34 = arith.constant 0 : index
    %c240 = arith.constant 240 : index
    %87 = vector.load %arg3[%c0_33, %c0_34, %c240] : memref<1x4x256xf32, #tpu.memory_space<vmem>>, vector<1x1x16xf32>
    %88 = vector.shape_cast %87 : vector<1x1x16xf32> to vector<1x16xf32>
    %89 = vector.shape_cast %86 : vector<1x16xf32> to vector<1x1x16xf32>
    tpu.vector_store %arg3[%c0_33, %c0_34, %c240], %89 {strides = array<i32>} : memref<1x4x256xf32, #tpu.memory_space<vmem>>, vector<1x1x16xf32>,
    %90 = vector.extract_strided_slice %25 {offsets = [0, 0], sizes = [1, 16], strides = [1, 1]} : vector<16x16xf32> to vector<1x16xf32>
    %c0_35 = arith.constant 0 : index
    %c1 = arith.constant 1 : index
    %c0_36 = arith.constant 0 : index
    %91 = vector.load %arg3[%c0_35, %c1, %c0_36] : memref<1x4x256xf32, #tpu.memory_space<vmem>>, vector<1x1x16xf32>
    %92 = vector.shape_cast %91 : vector<1x1x16xf32> to vector<1x16xf32>
    %93 = vector.shape_cast %90 : vector<1x16xf32> to vector<1x1x16xf32>
    tpu.vector_store %arg3[%c0_35, %c1, %c0_36], %93 {strides = array<i32>} : memref<1x4x256xf32, #tpu.memory_space<vmem>>, vector<1x1x16xf32>,
    %94 = vector.extract_strided_slice %25 {offsets = [1, 0], sizes = [1, 16], strides = [1, 1]} : vector<16x16xf32> to vector<1x16xf32>
    %c0_37 = arith.constant 0 : index
    %c1_38 = arith.constant 1 : index
    %c16_39 = arith.constant 16 : index
    %95 = vector.load %arg3[%c0_37, %c1_38, %c16_39] : memref<1x4x256xf32, #tpu.memory_space<vmem>>, vector<1x1x16xf32>
    %96 = vector.shape_cast %95 : vector<1x1x16xf32> to vector<1x16xf32>
    %97 = vector.shape_cast %94 : vector<1x16xf32> to vector<1x1x16xf32>
    tpu.vector_store %arg3[%c0_37, %c1_38, %c16_39], %97 {strides = array<i32>} : memref<1x4x256xf32, #tpu.memory_space<vmem>>, vector<1x1x16xf32>,
    %98 = vector.extract_strided_slice %25 {offsets = [2, 0], sizes = [1, 16], strides = [1, 1]} : vector<16x16xf32> to vector<1x16xf32>
    %c0_40 = arith.constant 0 : index
    %c1_41 = arith.constant 1 : index
    %c32_42 = arith.constant 32 : index
    %99 = vector.load %arg3[%c0_40, %c1_41, %c32_42] : memref<1x4x256xf32, #tpu.memory_space<vmem>>, vector<1x1x16xf32>
    %100 = vector.shape_cast %99 : vector<1x1x16xf32> to vector<1x16xf32>
    %101 = vector.shape_cast %98 : vector<1x16xf32> to vector<1x1x16xf32>
    tpu.vector_store %arg3[%c0_40, %c1_41, %c32_42], %101 {strides = array<i32>} : memref<1x4x256xf32, #tpu.memory_space<vmem>>, vector<1x1x16xf32>,
    %102 = vector.extract_strided_slice %25 {offsets = [3, 0], sizes = [1, 16], strides = [1, 1]} : vector<16x16xf32> to vector<1x16xf32>
    %c0_43 = arith.constant 0 : index
    %c1_44 = arith.constant 1 : index
    %c48_45 = arith.constant 48 : index
    %103 = vector.load %arg3[%c0_43, %c1_44, %c48_45] : memref<1x4x256xf32, #tpu.memory_space<vmem>>, vector<1x1x16xf32>
    %104 = vector.shape_cast %103 : vector<1x1x16xf32> to vector<1x16xf32>
    %105 = vector.shape_cast %102 : vector<1x16xf32> to vector<1x1x16xf32>
    tpu.vector_store %arg3[%c0_43, %c1_44, %c48_45], %105 {strides = array<i32>} : memref<1x4x256xf32, #tpu.memory_space<vmem>>, vector<1x1x16xf32>,
    %106 = vector.extract_strided_slice %25 {offsets = [4, 0], sizes = [1, 16], strides = [1, 1]} : vector<16x16xf32> to vector<1x16xf32>
    %c0_46 = arith.constant 0 : index
    %c1_47 = arith.constant 1 : index
    %c64_48 = arith.constant 64 : index
    %107 = vector.load %arg3[%c0_46, %c1_47, %c64_48] : memref<1x4x256xf32, #tpu.memory_space<vmem>>, vector<1x1x16xf32>
    %108 = vector.shape_cast %107 : vector<1x1x16xf32> to vector<1x16xf32>
    %109 = vector.shape_cast %106 : vector<1x16xf32> to vector<1x1x16xf32>
    tpu.vector_store %arg3[%c0_46, %c1_47, %c64_48], %109 {strides = array<i32>} : memref<1x4x256xf32, #tpu.memory_space<vmem>>, vector<1x1x16xf32>,
    %110 = vector.extract_strided_slice %25 {offsets = [5, 0], sizes = [1, 16], strides = [1, 1]} : vector<16x16xf32> to vector<1x16xf32>
    %c0_49 = arith.constant 0 : index
    %c1_50 = arith.constant 1 : index
    %c80_51 = arith.constant 80 : index
    %111 = vector.load %arg3[%c0_49, %c1_50, %c80_51] : memref<1x4x256xf32, #tpu.memory_space<vmem>>, vector<1x1x16xf32>
    %112 = vector.shape_cast %111 : vector<1x1x16xf32> to vector<1x16xf32>
    %113 = vector.shape_cast %110 : vector<1x16xf32> to vector<1x1x16xf32>
    tpu.vector_store %arg3[%c0_49, %c1_50, %c80_51], %113 {strides = array<i32>} : memref<1x4x256xf32, #tpu.memory_space<vmem>>, vector<1x1x16xf32>,
    %114 = vector.extract_strided_slice %25 {offsets = [6, 0], sizes = [1, 16], strides = [1, 1]} : vector<16x16xf32> to vector<1x16xf32>
    %c0_52 = arith.constant 0 : index
    %c1_53 = arith.constant 1 : index
    %c96_54 = arith.constant 96 : index
    %115 = vector.load %arg3[%c0_52, %c1_53, %c96_54] : memref<1x4x256xf32, #tpu.memory_space<vmem>>, vector<1x1x16xf32>
    %116 = vector.shape_cast %115 : vector<1x1x16xf32> to vector<1x16xf32>
    %117 = vector.shape_cast %114 : vector<1x16xf32> to vector<1x1x16xf32>
    tpu.vector_store %arg3[%c0_52, %c1_53, %c96_54], %117 {strides = array<i32>} : memref<1x4x256xf32, #tpu.memory_space<vmem>>, vector<1x1x16xf32>,
    %118 = vector.extract_strided_slice %25 {offsets = [7, 0], sizes = [1, 16], strides = [1, 1]} : vector<16x16xf32> to vector<1x16xf32>
    %c0_55 = arith.constant 0 : index
    %c1_56 = arith.constant 1 : index
    %c112_57 = arith.constant 112 : index
    %119 = vector.load %arg3[%c0_55, %c1_56, %c112_57] : memref<1x4x256xf32, #tpu.memory_space<vmem>>, vector<1x1x16xf32>
    %120 = vector.shape_cast %119 : vector<1x1x16xf32> to vector<1x16xf32>
    %121 = vector.shape_cast %118 : vector<1x16xf32> to vector<1x1x16xf32>
    tpu.vector_store %arg3[%c0_55, %c1_56, %c112_57], %121 {strides = array<i32>} : memref<1x4x256xf32, #tpu.memory_space<vmem>>, vector<1x1x16xf32>,
    %122 = vector.extract_strided_slice %25 {offsets = [8, 0], sizes = [1, 16], strides = [1, 1]} : vector<16x16xf32> to vector<1x16xf32>
    %c0_58 = arith.constant 0 : index
    %c1_59 = arith.constant 1 : index
    %c128_60 = arith.constant 128 : index
    %123 = vector.load %arg3[%c0_58, %c1_59, %c128_60] : memref<1x4x256xf32, #tpu.memory_space<vmem>>, vector<1x1x16xf32>
    %124 = vector.shape_cast %123 : vector<1x1x16xf32> to vector<1x16xf32>
    %125 = vector.shape_cast %122 : vector<1x16xf32> to vector<1x1x16xf32>
    tpu.vector_store %arg3[%c0_58, %c1_59, %c128_60], %125 {strides = array<i32>} : memref<1x4x256xf32, #tpu.memory_space<vmem>>, vector<1x1x16xf32>,
    %126 = vector.extract_strided_slice %25 {offsets = [9, 0], sizes = [1, 16], strides = [1, 1]} : vector<16x16xf32> to vector<1x16xf32>
    %c0_61 = arith.constant 0 : index
    %c1_62 = arith.constant 1 : index
    %c144_63 = arith.constant 144 : index
    %127 = vector.load %arg3[%c0_61, %c1_62, %c144_63] : memref<1x4x256xf32, #tpu.memory_space<vmem>>, vector<1x1x16xf32>
    %128 = vector.shape_cast %127 : vector<1x1x16xf32> to vector<1x16xf32>
    %129 = vector.shape_cast %126 : vector<1x16xf32> to vector<1x1x16xf32>
    tpu.vector_store %arg3[%c0_61, %c1_62, %c144_63], %129 {strides = array<i32>} : memref<1x4x256xf32, #tpu.memory_space<vmem>>, vector<1x1x16xf32>,
    %130 = vector.extract_strided_slice %25 {offsets = [10, 0], sizes = [1, 16], strides = [1, 1]} : vector<16x16xf32> to vector<1x16xf32>
    %c0_64 = arith.constant 0 : index
    %c1_65 = arith.constant 1 : index
    %c160_66 = arith.constant 160 : index
    %131 = vector.load %arg3[%c0_64, %c1_65, %c160_66] : memref<1x4x256xf32, #tpu.memory_space<vmem>>, vector<1x1x16xf32>
    %132 = vector.shape_cast %131 : vector<1x1x16xf32> to vector<1x16xf32>
    %133 = vector.shape_cast %130 : vector<1x16xf32> to vector<1x1x16xf32>
    tpu.vector_store %arg3[%c0_64, %c1_65, %c160_66], %133 {strides = array<i32>} : memref<1x4x256xf32, #tpu.memory_space<vmem>>, vector<1x1x16xf32>,
    %134 = vector.extract_strided_slice %25 {offsets = [11, 0], sizes = [1, 16], strides = [1, 1]} : vector<16x16xf32> to vector<1x16xf32>
    %c0_67 = arith.constant 0 : index
    %c1_68 = arith.constant 1 : index
    %c176_69 = arith.constant 176 : index
    %135 = vector.load %arg3[%c0_67, %c1_68, %c176_69] : memref<1x4x256xf32, #tpu.memory_space<vmem>>, vector<1x1x16xf32>
    %136 = vector.shape_cast %135 : vector<1x1x16xf32> to vector<1x16xf32>
    %137 = vector.shape_cast %134 : vector<1x16xf32> to vector<1x1x16xf32>
    tpu.vector_store %arg3[%c0_67, %c1_68, %c176_69], %137 {strides = array<i32>} : memref<1x4x256xf32, #tpu.memory_space<vmem>>, vector<1x1x16xf32>,
    %138 = vector.extract_strided_slice %25 {offsets = [12, 0], sizes = [1, 16], strides = [1, 1]} : vector<16x16xf32> to vector<1x16xf32>
    %c0_70 = arith.constant 0 : index
    %c1_71 = arith.constant 1 : index
    %c192_72 = arith.constant 192 : index
    %139 = vector.load %arg3[%c0_70, %c1_71, %c192_72] : memref<1x4x256xf32, #tpu.memory_space<vmem>>, vector<1x1x16xf32>
    %140 = vector.shape_cast %139 : vector<1x1x16xf32> to vector<1x16xf32>
    %141 = vector.shape_cast %138 : vector<1x16xf32> to vector<1x1x16xf32>
    tpu.vector_store %arg3[%c0_70, %c1_71, %c192_72], %141 {strides = array<i32>} : memref<1x4x256xf32, #tpu.memory_space<vmem>>, vector<1x1x16xf32>,
    %142 = vector.extract_strided_slice %25 {offsets = [13, 0], sizes = [1, 16], strides = [1, 1]} : vector<16x16xf32> to vector<1x16xf32>
    %c0_73 = arith.constant 0 : index
    %c1_74 = arith.constant 1 : index
    %c208_75 = arith.constant 208 : index
    %143 = vector.load %arg3[%c0_73, %c1_74, %c208_75] : memref<1x4x256xf32, #tpu.memory_space<vmem>>, vector<1x1x16xf32>
    %144 = vector.shape_cast %143 : vector<1x1x16xf32> to vector<1x16xf32>
    %145 = vector.shape_cast %142 : vector<1x16xf32> to vector<1x1x16xf32>
    tpu.vector_store %arg3[%c0_73, %c1_74, %c208_75], %145 {strides = array<i32>} : memref<1x4x256xf32, #tpu.memory_space<vmem>>, vector<1x1x16xf32>,
    %146 = vector.extract_strided_slice %25 {offsets = [14, 0], sizes = [1, 16], strides = [1, 1]} : vector<16x16xf32> to vector<1x16xf32>
    %c0_76 = arith.constant 0 : index
    %c1_77 = arith.constant 1 : index
    %c224_78 = arith.constant 224 : index
    %147 = vector.load %arg3[%c0_76, %c1_77, %c224_78] : memref<1x4x256xf32, #tpu.memory_space<vmem>>, vector<1x1x16xf32>
    %148 = vector.shape_cast %147 : vector<1x1x16xf32> to vector<1x16xf32>
    %149 = vector.shape_cast %146 : vector<1x16xf32> to vector<1x1x16xf32>
    tpu.vector_store %arg3[%c0_76, %c1_77, %c224_78], %149 {strides = array<i32>} : memref<1x4x256xf32, #tpu.memory_space<vmem>>, vector<1x1x16xf32>,
    %150 = vector.extract_strided_slice %25 {offsets = [15, 0], sizes = [1, 16], strides = [1, 1]} : vector<16x16xf32> to vector<1x16xf32>
    %c0_79 = arith.constant 0 : index
    %c1_80 = arith.constant 1 : index
    %c240_81 = arith.constant 240 : index
    %151 = vector.load %arg3[%c0_79, %c1_80, %c240_81] : memref<1x4x256xf32, #tpu.memory_space<vmem>>, vector<1x1x16xf32>
    %152 = vector.shape_cast %151 : vector<1x1x16xf32> to vector<1x16xf32>
    %153 = vector.shape_cast %150 : vector<1x16xf32> to vector<1x1x16xf32>
    tpu.vector_store %arg3[%c0_79, %c1_80, %c240_81], %153 {strides = array<i32>} : memref<1x4x256xf32, #tpu.memory_space<vmem>>, vector<1x1x16xf32>,
    %154 = vector.extract_strided_slice %25 {offsets = [0, 0], sizes = [1, 16], strides = [1, 1]} : vector<16x16xf32> to vector<1x16xf32>
    %c0_82 = arith.constant 0 : index
    %c2 = arith.constant 2 : index
    %c0_83 = arith.constant 0 : index
    %155 = vector.load %arg3[%c0_82, %c2, %c0_83] : memref<1x4x256xf32, #tpu.memory_space<vmem>>, vector<1x1x16xf32>
    %156 = vector.shape_cast %155 : vector<1x1x16xf32> to vector<1x16xf32>
    %157 = vector.shape_cast %154 : vector<1x16xf32> to vector<1x1x16xf32>
    tpu.vector_store %arg3[%c0_82, %c2, %c0_83], %157 {strides = array<i32>} : memref<1x4x256xf32, #tpu.memory_space<vmem>>, vector<1x1x16xf32>,
    %158 = vector.extract_strided_slice %25 {offsets = [1, 0], sizes = [1, 16], strides = [1, 1]} : vector<16x16xf32> to vector<1x16xf32>
    %c0_84 = arith.constant 0 : index
    %c2_85 = arith.constant 2 : index
    %c16_86 = arith.constant 16 : index
    %159 = vector.load %arg3[%c0_84, %c2_85, %c16_86] : memref<1x4x256xf32, #tpu.memory_space<vmem>>, vector<1x1x16xf32>
    %160 = vector.shape_cast %159 : vector<1x1x16xf32> to vector<1x16xf32>
    %161 = vector.shape_cast %158 : vector<1x16xf32> to vector<1x1x16xf32>
    tpu.vector_store %arg3[%c0_84, %c2_85, %c16_86], %161 {strides = array<i32>} : memref<1x4x256xf32, #tpu.memory_space<vmem>>, vector<1x1x16xf32>,
    %162 = vector.extract_strided_slice %25 {offsets = [2, 0], sizes = [1, 16], strides = [1, 1]} : vector<16x16xf32> to vector<1x16xf32>
    %c0_87 = arith.constant 0 : index
    %c2_88 = arith.constant 2 : index
    %c32_89 = arith.constant 32 : index
    %163 = vector.load %arg3[%c0_87, %c2_88, %c32_89] : memref<1x4x256xf32, #tpu.memory_space<vmem>>, vector<1x1x16xf32>
    %164 = vector.shape_cast %163 : vector<1x1x16xf32> to vector<1x16xf32>
    %165 = vector.shape_cast %162 : vector<1x16xf32> to vector<1x1x16xf32>
    tpu.vector_store %arg3[%c0_87, %c2_88, %c32_89], %165 {strides = array<i32>} : memref<1x4x256xf32, #tpu.memory_space<vmem>>, vector<1x1x16xf32>,
    %166 = vector.extract_strided_slice %25 {offsets = [3, 0], sizes = [1, 16], strides = [1, 1]} : vector<16x16xf32> to vector<1x16xf32>
    %c0_90 = arith.constant 0 : index
    %c2_91 = arith.constant 2 : index
    %c48_92 = arith.constant 48 : index
    %167 = vector.load %arg3[%c0_90, %c2_91, %c48_92] : memref<1x4x256xf32, #tpu.memory_space<vmem>>, vector<1x1x16xf32>
    %168 = vector.shape_cast %167 : vector<1x1x16xf32> to vector<1x16xf32>
    %169 = vector.shape_cast %166 : vector<1x16xf32> to vector<1x1x16xf32>
    tpu.vector_store %arg3[%c0_90, %c2_91, %c48_92], %169 {strides = array<i32>} : memref<1x4x256xf32, #tpu.memory_space<vmem>>, vector<1x1x16xf32>,
    %170 = vector.extract_strided_slice %25 {offsets = [4, 0], sizes = [1, 16], strides = [1, 1]} : vector<16x16xf32> to vector<1x16xf32>
    %c0_93 = arith.constant 0 : index
    %c2_94 = arith.constant 2 : index
    %c64_95 = arith.constant 64 : index
    %171 = vector.load %arg3[%c0_93, %c2_94, %c64_95] : memref<1x4x256xf32, #tpu.memory_space<vmem>>, vector<1x1x16xf32>
    %172 = vector.shape_cast %171 : vector<1x1x16xf32> to vector<1x16xf32>
    %173 = vector.shape_cast %170 : vector<1x16xf32> to vector<1x1x16xf32>
    tpu.vector_store %arg3[%c0_93, %c2_94, %c64_95], %173 {strides = array<i32>} : memref<1x4x256xf32, #tpu.memory_space<vmem>>, vector<1x1x16xf32>,
    %174 = vector.extract_strided_slice %25 {offsets = [5, 0], sizes = [1, 16], strides = [1, 1]} : vector<16x16xf32> to vector<1x16xf32>
    %c0_96 = arith.constant 0 : index
    %c2_97 = arith.constant 2 : index
    %c80_98 = arith.constant 80 : index
    %175 = vector.load %arg3[%c0_96, %c2_97, %c80_98] : memref<1x4x256xf32, #tpu.memory_space<vmem>>, vector<1x1x16xf32>
    %176 = vector.shape_cast %175 : vector<1x1x16xf32> to vector<1x16xf32>
    %177 = vector.shape_cast %174 : vector<1x16xf32> to vector<1x1x16xf32>
    tpu.vector_store %arg3[%c0_96, %c2_97, %c80_98], %177 {strides = array<i32>} : memref<1x4x256xf32, #tpu.memory_space<vmem>>, vector<1x1x16xf32>,
    %178 = vector.extract_strided_slice %25 {offsets = [6, 0], sizes = [1, 16], strides = [1, 1]} : vector<16x16xf32> to vector<1x16xf32>
    %c0_99 = arith.constant 0 : index
    %c2_100 = arith.constant 2 : index
    %c96_101 = arith.constant 96 : index
    %179 = vector.load %arg3[%c0_99, %c2_100, %c96_101] : memref<1x4x256xf32, #tpu.memory_space<vmem>>, vector<1x1x16xf32>
    %180 = vector.shape_cast %179 : vector<1x1x16xf32> to vector<1x16xf32>
    %181 = vector.shape_cast %178 : vector<1x16xf32> to vector<1x1x16xf32>
    tpu.vector_store %arg3[%c0_99, %c2_100, %c96_101], %181 {strides = array<i32>} : memref<1x4x256xf32, #tpu.memory_space<vmem>>, vector<1x1x16xf32>,
    %182 = vector.extract_strided_slice %25 {offsets = [7, 0], sizes = [1, 16], strides = [1, 1]} : vector<16x16xf32> to vector<1x16xf32>
    %c0_102 = arith.constant 0 : index
    %c2_103 = arith.constant 2 : index
    %c112_104 = arith.constant 112 : index
    %183 = vector.load %arg3[%c0_102, %c2_103, %c112_104] : memref<1x4x256xf32, #tpu.memory_space<vmem>>, vector<1x1x16xf32>
    %184 = vector.shape_cast %183 : vector<1x1x16xf32> to vector<1x16xf32>
    %185 = vector.shape_cast %182 : vector<1x16xf32> to vector<1x1x16xf32>
    tpu.vector_store %arg3[%c0_102, %c2_103, %c112_104], %185 {strides = array<i32>} : memref<1x4x256xf32, #tpu.memory_space<vmem>>, vector<1x1x16xf32>,
    %186 = vector.extract_strided_slice %25 {offsets = [8, 0], sizes = [1, 16], strides = [1, 1]} : vector<16x16xf32> to vector<1x16xf32>
    %c0_105 = arith.constant 0 : index
    %c2_106 = arith.constant 2 : index
    %c128_107 = arith.constant 128 : index
    %187 = vector.load %arg3[%c0_105, %c2_106, %c128_107] : memref<1x4x256xf32, #tpu.memory_space<vmem>>, vector<1x1x16xf32>
    %188 = vector.shape_cast %187 : vector<1x1x16xf32> to vector<1x16xf32>
    %189 = vector.shape_cast %186 : vector<1x16xf32> to vector<1x1x16xf32>
    tpu.vector_store %arg3[%c0_105, %c2_106, %c128_107], %189 {strides = array<i32>} : memref<1x4x256xf32, #tpu.memory_space<vmem>>, vector<1x1x16xf32>,
    %190 = vector.extract_strided_slice %25 {offsets = [9, 0], sizes = [1, 16], strides = [1, 1]} : vector<16x16xf32> to vector<1x16xf32>
    %c0_108 = arith.constant 0 : index
    %c2_109 = arith.constant 2 : index
    %c144_110 = arith.constant 144 : index
    %191 = vector.load %arg3[%c0_108, %c2_109, %c144_110] : memref<1x4x256xf32, #tpu.memory_space<vmem>>, vector<1x1x16xf32>
    %192 = vector.shape_cast %191 : vector<1x1x16xf32> to vector<1x16xf32>
    %193 = vector.shape_cast %190 : vector<1x16xf32> to vector<1x1x16xf32>
    tpu.vector_store %arg3[%c0_108, %c2_109, %c144_110], %193 {strides = array<i32>} : memref<1x4x256xf32, #tpu.memory_space<vmem>>, vector<1x1x16xf32>,
    %194 = vector.extract_strided_slice %25 {offsets = [10, 0], sizes = [1, 16], strides = [1, 1]} : vector<16x16xf32> to vector<1x16xf32>
    %c0_111 = arith.constant 0 : index
    %c2_112 = arith.constant 2 : index
    %c160_113 = arith.constant 160 : index
    %195 = vector.load %arg3[%c0_111, %c2_112, %c160_113] : memref<1x4x256xf32, #tpu.memory_space<vmem>>, vector<1x1x16xf32>
    %196 = vector.shape_cast %195 : vector<1x1x16xf32> to vector<1x16xf32>
    %197 = vector.shape_cast %194 : vector<1x16xf32> to vector<1x1x16xf32>
    tpu.vector_store %arg3[%c0_111, %c2_112, %c160_113], %197 {strides = array<i32>} : memref<1x4x256xf32, #tpu.memory_space<vmem>>, vector<1x1x16xf32>,
    %198 = vector.extract_strided_slice %25 {offsets = [11, 0], sizes = [1, 16], strides = [1, 1]} : vector<16x16xf32> to vector<1x16xf32>
    %c0_114 = arith.constant 0 : index
    %c2_115 = arith.constant 2 : index
    %c176_116 = arith.constant 176 : index
    %199 = vector.load %arg3[%c0_114, %c2_115, %c176_116] : memref<1x4x256xf32, #tpu.memory_space<vmem>>, vector<1x1x16xf32>
    %200 = vector.shape_cast %199 : vector<1x1x16xf32> to vector<1x16xf32>
    %201 = vector.shape_cast %198 : vector<1x16xf32> to vector<1x1x16xf32>
    tpu.vector_store %arg3[%c0_114, %c2_115, %c176_116], %201 {strides = array<i32>} : memref<1x4x256xf32, #tpu.memory_space<vmem>>, vector<1x1x16xf32>,
    %202 = vector.extract_strided_slice %25 {offsets = [12, 0], sizes = [1, 16], strides = [1, 1]} : vector<16x16xf32> to vector<1x16xf32>
    %c0_117 = arith.constant 0 : index
    %c2_118 = arith.constant 2 : index
    %c192_119 = arith.constant 192 : index
    %203 = vector.load %arg3[%c0_117, %c2_118, %c192_119] : memref<1x4x256xf32, #tpu.memory_space<vmem>>, vector<1x1x16xf32>
    %204 = vector.shape_cast %203 : vector<1x1x16xf32> to vector<1x16xf32>
    %205 = vector.shape_cast %202 : vector<1x16xf32> to vector<1x1x16xf32>
    tpu.vector_store %arg3[%c0_117, %c2_118, %c192_119], %205 {strides = array<i32>} : memref<1x4x256xf32, #tpu.memory_space<vmem>>, vector<1x1x16xf32>,
    %206 = vector.extract_strided_slice %25 {offsets = [13, 0], sizes = [1, 16], strides = [1, 1]} : vector<16x16xf32> to vector<1x16xf32>
    %c0_120 = arith.constant 0 : index
    %c2_121 = arith.constant 2 : index
    %c208_122 = arith.constant 208 : index
    %207 = vector.load %arg3[%c0_120, %c2_121, %c208_122] : memref<1x4x256xf32, #tpu.memory_space<vmem>>, vector<1x1x16xf32>
    %208 = vector.shape_cast %207 : vector<1x1x16xf32> to vector<1x16xf32>
    %209 = vector.shape_cast %206 : vector<1x16xf32> to vector<1x1x16xf32>
    tpu.vector_store %arg3[%c0_120, %c2_121, %c208_122], %209 {strides = array<i32>} : memref<1x4x256xf32, #tpu.memory_space<vmem>>, vector<1x1x16xf32>,
    %210 = vector.extract_strided_slice %25 {offsets = [14, 0], sizes = [1, 16], strides = [1, 1]} : vector<16x16xf32> to vector<1x16xf32>
    %c0_123 = arith.constant 0 : index
    %c2_124 = arith.constant 2 : index
    %c224_125 = arith.constant 224 : index
    %211 = vector.load %arg3[%c0_123, %c2_124, %c224_125] : memref<1x4x256xf32, #tpu.memory_space<vmem>>, vector<1x1x16xf32>
    %212 = vector.shape_cast %211 : vector<1x1x16xf32> to vector<1x16xf32>
    %213 = vector.shape_cast %210 : vector<1x16xf32> to vector<1x1x16xf32>
    tpu.vector_store %arg3[%c0_123, %c2_124, %c224_125], %213 {strides = array<i32>} : memref<1x4x256xf32, #tpu.memory_space<vmem>>, vector<1x1x16xf32>,
    %214 = vector.extract_strided_slice %25 {offsets = [15, 0], sizes = [1, 16], strides = [1, 1]} : vector<16x16xf32> to vector<1x16xf32>
    %c0_126 = arith.constant 0 : index
    %c2_127 = arith.constant 2 : index
    %c240_128 = arith.constant 240 : index
    %215 = vector.load %arg3[%c0_126, %c2_127, %c240_128] : memref<1x4x256xf32, #tpu.memory_space<vmem>>, vector<1x1x16xf32>
    %216 = vector.shape_cast %215 : vector<1x1x16xf32> to vector<1x16xf32>
    %217 = vector.shape_cast %214 : vector<1x16xf32> to vector<1x1x16xf32>
    tpu.vector_store %arg3[%c0_126, %c2_127, %c240_128], %217 {strides = array<i32>} : memref<1x4x256xf32, #tpu.memory_space<vmem>>, vector<1x1x16xf32>,
    %218 = vector.extract_strided_slice %25 {offsets = [0, 0], sizes = [1, 16], strides = [1, 1]} : vector<16x16xf32> to vector<1x16xf32>
    %c0_129 = arith.constant 0 : index
    %c3 = arith.constant 3 : index
    %c0_130 = arith.constant 0 : index
    %219 = vector.load %arg3[%c0_129, %c3, %c0_130] : memref<1x4x256xf32, #tpu.memory_space<vmem>>, vector<1x1x16xf32>
    %220 = vector.shape_cast %219 : vector<1x1x16xf32> to vector<1x16xf32>
    %221 = vector.shape_cast %218 : vector<1x16xf32> to vector<1x1x16xf32>
    tpu.vector_store %arg3[%c0_129, %c3, %c0_130], %221 {strides = array<i32>} : memref<1x4x256xf32, #tpu.memory_space<vmem>>, vector<1x1x16xf32>,
    %222 = vector.extract_strided_slice %25 {offsets = [1, 0], sizes = [1, 16], strides = [1, 1]} : vector<16x16xf32> to vector<1x16xf32>
    %c0_131 = arith.constant 0 : index
    %c3_132 = arith.constant 3 : index
    %c16_133 = arith.constant 16 : index
    %223 = vector.load %arg3[%c0_131, %c3_132, %c16_133] : memref<1x4x256xf32, #tpu.memory_space<vmem>>, vector<1x1x16xf32>
    %224 = vector.shape_cast %223 : vector<1x1x16xf32> to vector<1x16xf32>
    %225 = vector.shape_cast %222 : vector<1x16xf32> to vector<1x1x16xf32>
    tpu.vector_store %arg3[%c0_131, %c3_132, %c16_133], %225 {strides = array<i32>} : memref<1x4x256xf32, #tpu.memory_space<vmem>>, vector<1x1x16xf32>,
    %226 = vector.extract_strided_slice %25 {offsets = [2, 0], sizes = [1, 16], strides = [1, 1]} : vector<16x16xf32> to vector<1x16xf32>
    %c0_134 = arith.constant 0 : index
    %c3_135 = arith.constant 3 : index
    %c32_136 = arith.constant 32 : index
    %227 = vector.load %arg3[%c0_134, %c3_135, %c32_136] : memref<1x4x256xf32, #tpu.memory_space<vmem>>, vector<1x1x16xf32>
    %228 = vector.shape_cast %227 : vector<1x1x16xf32> to vector<1x16xf32>
    %229 = vector.shape_cast %226 : vector<1x16xf32> to vector<1x1x16xf32>
    tpu.vector_store %arg3[%c0_134, %c3_135, %c32_136], %229 {strides = array<i32>} : memref<1x4x256xf32, #tpu.memory_space<vmem>>, vector<1x1x16xf32>,
    %230 = vector.extract_strided_slice %25 {offsets = [3, 0], sizes = [1, 16], strides = [1, 1]} : vector<16x16xf32> to vector<1x16xf32>
    %c0_137 = arith.constant 0 : index
    %c3_138 = arith.constant 3 : index
    %c48_139 = arith.constant 48 : index
    %231 = vector.load %arg3[%c0_137, %c3_138, %c48_139] : memref<1x4x256xf32, #tpu.memory_space<vmem>>, vector<1x1x16xf32>
    %232 = vector.shape_cast %231 : vector<1x1x16xf32> to vector<1x16xf32>
    %233 = vector.shape_cast %230 : vector<1x16xf32> to vector<1x1x16xf32>
    tpu.vector_store %arg3[%c0_137, %c3_138, %c48_139], %233 {strides = array<i32>} : memref<1x4x256xf32, #tpu.memory_space<vmem>>, vector<1x1x16xf32>,
    %234 = vector.extract_strided_slice %25 {offsets = [4, 0], sizes = [1, 16], strides = [1, 1]} : vector<16x16xf32> to vector<1x16xf32>
    %c0_140 = arith.constant 0 : index
    %c3_141 = arith.constant 3 : index
    %c64_142 = arith.constant 64 : index
    %235 = vector.load %arg3[%c0_140, %c3_141, %c64_142] : memref<1x4x256xf32, #tpu.memory_space<vmem>>, vector<1x1x16xf32>
    %236 = vector.shape_cast %235 : vector<1x1x16xf32> to vector<1x16xf32>
    %237 = vector.shape_cast %234 : vector<1x16xf32> to vector<1x1x16xf32>
    tpu.vector_store %arg3[%c0_140, %c3_141, %c64_142], %237 {strides = array<i32>} : memref<1x4x256xf32, #tpu.memory_space<vmem>>, vector<1x1x16xf32>,
    %238 = vector.extract_strided_slice %25 {offsets = [5, 0], sizes = [1, 16], strides = [1, 1]} : vector<16x16xf32> to vector<1x16xf32>
    %c0_143 = arith.constant 0 : index
    %c3_144 = arith.constant 3 : index
    %c80_145 = arith.constant 80 : index
    %239 = vector.load %arg3[%c0_143, %c3_144, %c80_145] : memref<1x4x256xf32, #tpu.memory_space<vmem>>, vector<1x1x16xf32>
    %240 = vector.shape_cast %239 : vector<1x1x16xf32> to vector<1x16xf32>
    %241 = vector.shape_cast %238 : vector<1x16xf32> to vector<1x1x16xf32>
    tpu.vector_store %arg3[%c0_143, %c3_144, %c80_145], %241 {strides = array<i32>} : memref<1x4x256xf32, #tpu.memory_space<vmem>>, vector<1x1x16xf32>,
    %242 = vector.extract_strided_slice %25 {offsets = [6, 0], sizes = [1, 16], strides = [1, 1]} : vector<16x16xf32> to vector<1x16xf32>
    %c0_146 = arith.constant 0 : index
    %c3_147 = arith.constant 3 : index
    %c96_148 = arith.constant 96 : index
    %243 = vector.load %arg3[%c0_146, %c3_147, %c96_148] : memref<1x4x256xf32, #tpu.memory_space<vmem>>, vector<1x1x16xf32>
    %244 = vector.shape_cast %243 : vector<1x1x16xf32> to vector<1x16xf32>
    %245 = vector.shape_cast %242 : vector<1x16xf32> to vector<1x1x16xf32>
    tpu.vector_store %arg3[%c0_146, %c3_147, %c96_148], %245 {strides = array<i32>} : memref<1x4x256xf32, #tpu.memory_space<vmem>>, vector<1x1x16xf32>,
    %246 = vector.extract_strided_slice %25 {offsets = [7, 0], sizes = [1, 16], strides = [1, 1]} : vector<16x16xf32> to vector<1x16xf32>
    %c0_149 = arith.constant 0 : index
    %c3_150 = arith.constant 3 : index
    %c112_151 = arith.constant 112 : index
    %247 = vector.load %arg3[%c0_149, %c3_150, %c112_151] : memref<1x4x256xf32, #tpu.memory_space<vmem>>, vector<1x1x16xf32>
    %248 = vector.shape_cast %247 : vector<1x1x16xf32> to vector<1x16xf32>
    %249 = vector.shape_cast %246 : vector<1x16xf32> to vector<1x1x16xf32>
    tpu.vector_store %arg3[%c0_149, %c3_150, %c112_151], %249 {strides = array<i32>} : memref<1x4x256xf32, #tpu.memory_space<vmem>>, vector<1x1x16xf32>,
    %250 = vector.extract_strided_slice %25 {offsets = [8, 0], sizes = [1, 16], strides = [1, 1]} : vector<16x16xf32> to vector<1x16xf32>
    %c0_152 = arith.constant 0 : index
    %c3_153 = arith.constant 3 : index
    %c128_154 = arith.constant 128 : index
    %251 = vector.load %arg3[%c0_152, %c3_153, %c128_154] : memref<1x4x256xf32, #tpu.memory_space<vmem>>, vector<1x1x16xf32>
    %252 = vector.shape_cast %251 : vector<1x1x16xf32> to vector<1x16xf32>
    %253 = vector.shape_cast %250 : vector<1x16xf32> to vector<1x1x16xf32>
    tpu.vector_store %arg3[%c0_152, %c3_153, %c128_154], %253 {strides = array<i32>} : memref<1x4x256xf32, #tpu.memory_space<vmem>>, vector<1x1x16xf32>,
    %254 = vector.extract_strided_slice %25 {offsets = [9, 0], sizes = [1, 16], strides = [1, 1]} : vector<16x16xf32> to vector<1x16xf32>
    %c0_155 = arith.constant 0 : index
    %c3_156 = arith.constant 3 : index
    %c144_157 = arith.constant 144 : index
    %255 = vector.load %arg3[%c0_155, %c3_156, %c144_157] : memref<1x4x256xf32, #tpu.memory_space<vmem>>, vector<1x1x16xf32>
    %256 = vector.shape_cast %255 : vector<1x1x16xf32> to vector<1x16xf32>
    %257 = vector.shape_cast %254 : vector<1x16xf32> to vector<1x1x16xf32>
    tpu.vector_store %arg3[%c0_155, %c3_156, %c144_157], %257 {strides = array<i32>} : memref<1x4x256xf32, #tpu.memory_space<vmem>>, vector<1x1x16xf32>,
    %258 = vector.extract_strided_slice %25 {offsets = [10, 0], sizes = [1, 16], strides = [1, 1]} : vector<16x16xf32> to vector<1x16xf32>
    %c0_158 = arith.constant 0 : index
    %c3_159 = arith.constant 3 : index
    %c160_160 = arith.constant 160 : index
    %259 = vector.load %arg3[%c0_158, %c3_159, %c160_160] : memref<1x4x256xf32, #tpu.memory_space<vmem>>, vector<1x1x16xf32>
    %260 = vector.shape_cast %259 : vector<1x1x16xf32> to vector<1x16xf32>
    %261 = vector.shape_cast %258 : vector<1x16xf32> to vector<1x1x16xf32>
    tpu.vector_store %arg3[%c0_158, %c3_159, %c160_160], %261 {strides = array<i32>} : memref<1x4x256xf32, #tpu.memory_space<vmem>>, vector<1x1x16xf32>,
    %262 = vector.extract_strided_slice %25 {offsets = [11, 0], sizes = [1, 16], strides = [1, 1]} : vector<16x16xf32> to vector<1x16xf32>
    %c0_161 = arith.constant 0 : index
    %c3_162 = arith.constant 3 : index
    %c176_163 = arith.constant 176 : index
    %263 = vector.load %arg3[%c0_161, %c3_162, %c176_163] : memref<1x4x256xf32, #tpu.memory_space<vmem>>, vector<1x1x16xf32>
    %264 = vector.shape_cast %263 : vector<1x1x16xf32> to vector<1x16xf32>
    %265 = vector.shape_cast %262 : vector<1x16xf32> to vector<1x1x16xf32>
    tpu.vector_store %arg3[%c0_161, %c3_162, %c176_163], %265 {strides = array<i32>} : memref<1x4x256xf32, #tpu.memory_space<vmem>>, vector<1x1x16xf32>,
    %266 = vector.extract_strided_slice %25 {offsets = [12, 0], sizes = [1, 16], strides = [1, 1]} : vector<16x16xf32> to vector<1x16xf32>
    %c0_164 = arith.constant 0 : index
    %c3_165 = arith.constant 3 : index
    %c192_166 = arith.constant 192 : index
    %267 = vector.load %arg3[%c0_164, %c3_165, %c192_166] : memref<1x4x256xf32, #tpu.memory_space<vmem>>, vector<1x1x16xf32>
    %268 = vector.shape_cast %267 : vector<1x1x16xf32> to vector<1x16xf32>
    %269 = vector.shape_cast %266 : vector<1x16xf32> to vector<1x1x16xf32>
    tpu.vector_store %arg3[%c0_164, %c3_165, %c192_166], %269 {strides = array<i32>} : memref<1x4x256xf32, #tpu.memory_space<vmem>>, vector<1x1x16xf32>,
    %270 = vector.extract_strided_slice %25 {offsets = [13, 0], sizes = [1, 16], strides = [1, 1]} : vector<16x16xf32> to vector<1x16xf32>
    %c0_167 = arith.constant 0 : index
    %c3_168 = arith.constant 3 : index
    %c208_169 = arith.constant 208 : index
    %271 = vector.load %arg3[%c0_167, %c3_168, %c208_169] : memref<1x4x256xf32, #tpu.memory_space<vmem>>, vector<1x1x16xf32>
    %272 = vector.shape_cast %271 : vector<1x1x16xf32> to vector<1x16xf32>
    %273 = vector.shape_cast %270 : vector<1x16xf32> to vector<1x1x16xf32>
    tpu.vector_store %arg3[%c0_167, %c3_168, %c208_169], %273 {strides = array<i32>} : memref<1x4x256xf32, #tpu.memory_space<vmem>>, vector<1x1x16xf32>,
    %274 = vector.extract_strided_slice %25 {offsets = [14, 0], sizes = [1, 16], strides = [1, 1]} : vector<16x16xf32> to vector<1x16xf32>
    %c0_170 = arith.constant 0 : index
    %c3_171 = arith.constant 3 : index
    %c224_172 = arith.constant 224 : index
    %275 = vector.load %arg3[%c0_170, %c3_171, %c224_172] : memref<1x4x256xf32, #tpu.memory_space<vmem>>, vector<1x1x16xf32>
    %276 = vector.shape_cast %275 : vector<1x1x16xf32> to vector<1x16xf32>
    %277 = vector.shape_cast %274 : vector<1x16xf32> to vector<1x1x16xf32>
    tpu.vector_store %arg3[%c0_170, %c3_171, %c224_172], %277 {strides = array<i32>} : memref<1x4x256xf32, #tpu.memory_space<vmem>>, vector<1x1x16xf32>,
    %278 = vector.extract_strided_slice %25 {offsets = [15, 0], sizes = [1, 16], strides = [1, 1]} : vector<16x16xf32> to vector<1x16xf32>
    %c0_173 = arith.constant 0 : index
    %c3_174 = arith.constant 3 : index
    %c240_175 = arith.constant 240 : index
    %279 = vector.load %arg3[%c0_173, %c3_174, %c240_175] : memref<1x4x256xf32, #tpu.memory_space<vmem>>, vector<1x1x16xf32>
    %280 = vector.shape_cast %279 : vector<1x1x16xf32> to vector<1x16xf32>
    %281 = vector.shape_cast %278 : vector<1x16xf32> to vector<1x1x16xf32>
    tpu.vector_store %arg3[%c0_173, %c3_174, %c240_175], %281 {strides = array<i32>} : memref<1x4x256xf32, #tpu.memory_space<vmem>>, vector<1x1x16xf32>,
    return
  }
  func.func @transform_0(%arg0: i32, %arg1: i32) -> (i32, i32, i32) {
    %c0_i32 = arith.constant 0 : i32
    %c0_i32_0 = arith.constant 0 : i32
    %c0_i32_1 = arith.constant 0 : i32
    return %arg0, %c0_i32, %c0_i32_0 : i32, i32, i32
  }
  func.func @transform_1(%arg0: i32, %arg1: i32) -> (i32, i32, i32) {
    %c0_i32 = arith.constant 0 : i32
    %c0_i32_0 = arith.constant 0 : i32
    return %arg0, %c0_i32, %arg1 : i32, i32, i32
  }
}

</mosaic_0001>

<bundles_post_ra>
// kernel: tpu_custom_call.1
= control target key start
LH: loop header
LB: loop body
LE: loop exit
PB: predicated region body
PF: predicated region fallthrough
CT: control target
= control target key end

     0   :  { %6 = vsyncpa [#allocation3], 0  ;;  %s881_s0 = inlined_call_operand.vmem [shape: f32[2,18,18], index: 0, kind: input, shape index: {}]   ;;  %s882_s1 = inlined_call_operand.hbm [shape: f32[2,4,256], index: 1, kind: output, shape index: {}]  }
   0x1   :  { %8 = vsyncpa [#allocation3 + $0x1], 0  ;;  %s639_s6 = smov 0   ;;  %s641_s7 = smov 0  }
   0x2   :  { %s643_s8 = smov 0   ;;  %s645_s9 = smov 0  }
   0x3   :  { %s647_s10 = smov 0   ;;  %s649_s11 = smov 0  }
   0x4 LB: > { %s449_s12 = sadd.s32 4294967295, %s616_s11   ;;  %s450_s13 = sadd.s32 4294967294, %s616_s11   ;;  %s616_s11 = sphi %s649_s11, %s14_s11   ;;  %s612_s10 = sphi %s647_s10, %s889_s10   ;;  %s608_s9 = sphi %s645_s9, %s888_s9   ;;  %s604_s8 = sphi %s643_s8, %s887_s8   ;;  %s600_s7 = sphi %s641_s7, %s886_s7   ;;  %s596_s6 = sphi %s639_s6, %s885_s6  }
   0x5   : > { %s26_s14 = sadd.s32 1, %s612_s10  ;;  %s61_s15 = sadd.s32 1, %s604_s8 }
   0x6   : > { %p28_p0 = scmp.ge.s32.totalorder %s26_s14, 2  ;;  %p71_p1 = scmp.ne.s32.totalorder %s604_s8, %s600_s7 }
   0x7   : > { %p72_p2 = scmp.eq.s32.totalorder %s449_s12, 1  ;;  %p77_p3 = scmp.ne.s32.totalorder %s600_s7, %s596_s6 }
   0x8   : > { %s891_s14 = smov (%p28_p0, %s26_s14), 0  ;;  %p78_p5 = scmp.eq.s32.totalorder %s450_s13, 1 }
   0x9   : > { %p679_p4 = por %p72_p2, %p71_p1  ;;  %s56_s17 = ssub.s32 %s612_s10, %s891_s14 }
   0xa   : > { %p453_p6 = scmp.ge.s32.totalorder %s616_s11, 1  ;;  %p59_p7 = scmp.eq.s32.totalorder %s56_s17, 0 }
   0xb   : > { %p686_p8 = por %p78_p5, %p77_p3  ;;  %p104_p9 = scmp.lt.s32.totalorder %s616_s11, 3 }
   0xc   : > { %s692_s19 = scalar_select %p59_p7, %s604_s8, %s61_s15  }
   0xd   : > { %p105_p10 = pnand %p453_p6, %p104_p9 }
   0xe   : > { %p124_p11 = scmp.lt.s32.totalorder (!%p105_p10), %s608_s9, 1  ;;  %s618_s25 = smov (!%p105_p10), 126  }
   0xf   : > { %108 = sbr.rel (%p105_p10) target bundleno = 432 (0x1b0), region = 24  ;;  %s619_s26 = smov (!%p105_p10), 127  }
  0x10   : > { %s620_s27 = smov (!%p105_p10), 2   ;;  %s621_s28 = smov (!%p105_p10), 14  }
  0x11   : > { %s622_s29 = smov (!%p105_p10), 30   ;;  %s623_s30 = smov (!%p105_p10), 46  }
  0x12   : > { %s624_s2 = smov (!%p105_p10), 62   ;;  %s625_s3 = smov (!%p105_p10), 78  }
  0x13   : > { %s626_s4 = smov (!%p105_p10), 94   ;;  %s627_s5 = smov (!%p105_p10), 110  }
  0x14   : > { %s125_s20 = scalar_select %p124_p11, %s608_s9, 1  ;;  %vm154_vm0 = vcmask 1045504   ;;  %vm141_vm1 = vcmask 1046528   ;;  %vm216_vm2 = vcmask 122880   ;;  %vm223_vm3 = vcmask 254080  }
  0x15   : > { %s121_s12 = sand.u32 1, %s600_s7   ;;  %vm230_vm4 = vcmask 385280   ;;  %vm237_vm5 = vcmask 516480   ;;  %vm243_vm6 = vcmask 647680   ;;  %vm250_vm7 = vcmask 778880   ;;  %s473_s17 = sshll.u32 %s608_s9, 7 }
  0x16   : > { %s474_s21 = smul.u32 24, %s125_s20  ;;  %s454_s13 = sshll.u32 %s121_s12, 3  ;;  %vm257_vm8 = vcmask 910080   ;;  %vm264_vm9 = vcmask 1041280  }
  0x17   : > { %s706_s15 = scalar_lea.vmem [#allocation2], %s454_s13  ;;  %s825_s22 = scalar_lea.hbm %s882_s1, %s473_s17 }
  0x18   : > { %s128_s24 = scalar_lea.vmem %s881_s0, %s474_s21  ;;  %s377_s20 = sshll.u32 %s706_s15, 4  ;;  %s827_s20 = int_to_ptr.vmem [resolvable:$true] %s377_s20 }
  0x19   : > { %v132_v0 = vld [vmem:[%s128_s24] sm:$0xff]  ;;  %v133_v1 = vld [vmem:[%s128_s24 + $0x8] sm:$0xff]  ;;  %v134_v2 = vld [vmem:[%s128_s24 + $0x10] sm:$0x3]  ;;  %s361_s23 = scalar_lea.sflag [#allocation3], %s121_s12  ;;  %s540_s24 = scalar_lea.vmem %s827_s20, 128 }
  0x1a   : > { %v155_v3 = vrot.slane %v132_v0, 2  ;;  %v156_v4 = vrot.slane %v133_v1, 2  ;;  %v158_v5 = vrot.slane %v134_v2, 2  ;;  %v135_v6 = vmul.f32 2.0, %v132_v0  ;;  %p541_p12 = scmp.ne.s32.totalorder %s827_s20, %s540_s24 }
  0x1b   : > { %v136_v7 = vmul.f32 2.0, %v133_v1  ;;  %v137_v8 = vmul.f32 2.0, %v134_v2 }
  0x1c   : > { %v157_v9 = vsel %vm154_vm0, %v155_v3, %v156_v4  ;;  %v159_v10 = vsel %vm154_vm0, %v156_v4, %v158_v5  ;;  %v142_v11 = vrot.slane %v135_v6, 1  ;;  %p542_p13 = pnand %p541_p12, %p679_p4 }
  0x1d   : > { %v164_v12 = vsub.f32 %v132_v0, %v157_v9  ;;  %v165_v13 = vsub.f32 %v133_v1, %v159_v10  ;;  %v143_v14 = vrot.slane %v136_v7, 1  ;;  %v145_v15 = vrot.slane %v137_v8, 1 }
  0x1e   : > { %p543_p0 = pneg %p542_p13 }
  0x1f   : > { %v176_v16 = vmul.f32 2.0, %v164_v12  ;;  %190 = vrot.lane.b32.xlu1 %v164_v12, %s618_s25  ;;  %v144_v17 = vsel %vm141_vm1, %v142_v11, %v143_v14  ;;  %v146_v18 = vsel %vm141_vm1, %v143_v14, %v145_v15  ;;  %v177_v20 = vmul.f32 2.0, %v165_v13 }
  0x20   : > { %v150_v19 = vadd.f32 %v146_v18, %v133_v1  ;;  %v149_v21 = vadd.f32 %v144_v17, %v132_v0 }
  0x21   : > { %180 = vrot.lane.b32.xlu0 %v176_v16, %s619_s26 }
  0x22   : > { %v163_v22 = vadd.f32 %v159_v10, %v150_v19  ;;  %v162_v23 = vadd.f32 %v157_v9, %v149_v21 }
  0x23   : > { %192 = vrot.lane.b32.xlu1 %v165_v13, %s618_s25 }
  0x25   : > { %182 = vrot.lane.b32.xlu0 %v177_v20, %s619_s26 }
  0x27   : > { %170 = vrot.lane.b32.xlu1 %v163_v22, %s620_s27 }
  0x29   : > { %168 = vrot.lane.b32.xlu0 %v162_v23, %s620_s27 }
  0x91   : > { %v191_v24 = vpop.permute.xlu1 %190 }
  0x93   : > { %v181_v25 = vpop.permute.xlu0 %180 }
  0x94   : > { %v186_v26 = vadd.f32 %v181_v25, %v164_v12 }
  0x95   : > { %v193_v29 = vpop.permute.xlu1 %192 }
  0x96   : > { %v196_v27 = vadd.f32 %v191_v24, %v186_v26 }
  0x97   : > { %v183_v28 = vpop.permute.xlu0 %182 }
  0x98   : > { %v200_v30 = vand.u32 2147483647, %v196_v27  ;;  %v187_v31 = vadd.f32 %v183_v28, %v165_v13 }
  0x99   : > { %v171_v36 = vpop.permute.xlu1 %170 }
  0x9a   : > { %v197_v32 = vadd.f32 %v193_v29, %v187_v31  ;;  %204 = vrot.lane.b32.xlu0 %v200_v30, %s620_s27  ;;  %v175_v38 = vsub.f32 %v163_v22, %v171_v36 }
  0x9b   : > { %v169_v34 = vpop.permute.xlu0 %168 }
  0x9c   : > { %v201_v33 = vand.u32 2147483647, %v197_v32  ;;  %v174_v35 = vsub.f32 %v162_v23, %v169_v34  ;;  %v199_v40 = vand.u32 2147483647, %v175_v38 }
  0x9e   : > { %206 = vrot.lane.b32.xlu1 %v201_v33, %s620_s27  ;;  %v198_v37 = vand.u32 2147483647, %v174_v35 }
 0x10c   : > { %v205_v39 = vpop.permute.xlu0 %204 }
 0x10d   : > { %v210_v41 = vadd.f32 %v205_v39, %v198_v37 }
 0x10f   : > { %213 = vrot.lane.b32.xlu0 %v210_v41, %s618_s25  ;;  %v456_v44 = vrot.slane %v210_v41, 9  ;;  %v457_v46 = vrot.slane %v210_v41, 10  ;;  %v458_v48 = vrot.slane %v210_v41, 11  ;;  %v239_v50 = vcombine.high %v210_v41, %v210_v41 }
 0x110   : > { %v207_v42 = vpop.permute.xlu1 %206 }
 0x111   : > { %v211_v43 = vadd.f32 %v207_v42, %v199_v40  ;;  %v459_v52 = vrot.slane %v239_v50, 9  ;;  %v460_v54 = vrot.slane %v239_v50, 10  ;;  %v461_v56 = vrot.slane %v239_v50, 11 }
 0x113   : > { %267 = vrot.lane.b32.xlu1 %v211_v43, %s618_s25  ;;  %220 = vrot.lane.b32.xlu0 %v456_v44, %s621_s28  ;;  %v462_v45 = vrot.slane %v211_v43, 9  ;;  %v463_v47 = vrot.slane %v211_v43, 10  ;;  %v464_v49 = vrot.slane %v211_v43, 11  ;;  %v289_v51 = vcombine.high %v211_v43, %v211_v43  ;;  %s628_s25 = smov [#allocation2]  }
 0x114   : > { %s544_s26 = sshll.u32 %s628_s25, 4  ;;  %s545_s26 = int_to_ptr.vmem [resolvable:$false] %s544_s26 }
 0x115   : > { %v465_v53 = vrot.slane %v289_v51, 9  ;;  %v466_v55 = vrot.slane %v289_v51, 10  ;;  %v467_v57 = vrot.slane %v289_v51, 11  ;;  %s546_s27 = scalar_lea.vmem %s545_s26, 256  ;;  %p547_p1 = scmp.lt.s32.totalorder %s827_s20, %s545_s26 }
 0x116   : > { %p548_p2 = scmp.lt.s32.totalorder %s546_s27, %s540_s24 }
 0x117   : > { %273 = vrot.lane.b32.xlu1 %v462_v45, %s621_s28  ;;  %227 = vrot.lane.b32.xlu0 %v457_v46, %s622_s29 }
 0x118   : > { %p549_p3 = por %p548_p2, %p547_p1 }
 0x11a   : > { %p550_p5 = pnand %p549_p3, %p543_p0 }
 0x11b   : > { %279 = vrot.lane.b32.xlu1 %v463_v47, %s622_s29  ;;  %234 = vrot.lane.b32.xlu0 %v458_v48, %s623_s30 }
 0x11f   : > { %285 = vrot.lane.b32.xlu1 %v464_v49, %s623_s30  ;;  %240 = vrot.lane.b32.xlu0 %v239_v50, %s624_s2 }
 0x123   : > { %290 = vrot.lane.b32.xlu1 %v289_v51, %s624_s2  ;;  %247 = vrot.lane.b32.xlu0 %v459_v52, %s625_s3 }
 0x127   : > { %296 = vrot.lane.b32.xlu1 %v465_v53, %s625_s3  ;;  %254 = vrot.lane.b32.xlu0 %v460_v54, %s626_s4 }
 0x12b   : > { %302 = vrot.lane.b32.xlu1 %v466_v55, %s626_s4  ;;  %261 = vrot.lane.b32.xlu0 %v461_v56, %s627_s5 }
 0x12f   : > { %308 = vrot.lane.b32.xlu1 %v467_v57, %s627_s5 }
 0x181   : > { %v214_v58 = vpop.permute.xlu0 %213 }
 0x182   : > { %217 = vst.msk [vmem:[%s706_s15] sm:$0x1] %vm216_vm2, %v214_v58  ;;  %312 = vst.msk [vmem:[%s706_s15 + $0x1] sm:$0x1] %vm216_vm2, %v214_v58 }
 0x183   : > { %328 = vst.msk [vmem:[%s706_s15 + $0x2] sm:$0x1] %vm216_vm2, %v214_v58  ;;  %344 = vst.msk [vmem:[%s706_s15 + $0x3] sm:$0x1] %vm216_vm2, %v214_v58 }
 0x185   : > { %v268_v59 = vpop.permute.xlu1 %267  ;;  %v221_v60 = vpop.permute.xlu0 %220 }
 0x186   : > { %270 = vst.msk [vmem:[%s706_s15 + $0x4] sm:$0x1] %vm216_vm2, %v268_v59  ;;  %320 = vst.msk [vmem:[%s706_s15 + $0x5] sm:$0x1] %vm216_vm2, %v268_v59 }
 0x187   : > { %336 = vst.msk [vmem:[%s706_s15 + $0x6] sm:$0x1] %vm216_vm2, %v268_v59  ;;  %352 = vst.msk [vmem:[%s706_s15 + $0x7] sm:$0x1] %vm216_vm2, %v268_v59 }
 0x188   : > { %224 = vst.msk [vmem:[%s706_s15] sm:$0x1] %vm223_vm3, %v221_v60  ;;  %313 = vst.msk [vmem:[%s706_s15 + $0x1] sm:$0x1] %vm223_vm3, %v221_v60 }
 0x189   : > { %329 = vst.msk [vmem:[%s706_s15 + $0x2] sm:$0x1] %vm223_vm3, %v221_v60  ;;  %345 = vst.msk [vmem:[%s706_s15 + $0x3] sm:$0x1] %vm223_vm3, %v221_v60  ;;  %v274_v61 = vpop.permute.xlu1 %273  ;;  %v228_v62 = vpop.permute.xlu0 %227 }
 0x18a   : > { %276 = vst.msk [vmem:[%s706_s15 + $0x4] sm:$0x1] %vm223_vm3, %v274_v61  ;;  %321 = vst.msk [vmem:[%s706_s15 + $0x5] sm:$0x1] %vm223_vm3, %v274_v61 }
 0x18b   : > { %337 = vst.msk [vmem:[%s706_s15 + $0x6] sm:$0x1] %vm223_vm3, %v274_v61  ;;  %353 = vst.msk [vmem:[%s706_s15 + $0x7] sm:$0x1] %vm223_vm3, %v274_v61 }
 0x18c   : > { %231 = vst.msk [vmem:[%s706_s15] sm:$0x1] %vm230_vm4, %v228_v62  ;;  %314 = vst.msk [vmem:[%s706_s15 + $0x1] sm:$0x1] %vm230_vm4, %v228_v62 }
 0x18d   : > { %330 = vst.msk [vmem:[%s706_s15 + $0x2] sm:$0x1] %vm230_vm4, %v228_v62  ;;  %346 = vst.msk [vmem:[%s706_s15 + $0x3] sm:$0x1] %vm230_vm4, %v228_v62  ;;  %v280_v63 = vpop.permute.xlu1 %279  ;;  %v235_v0 = vpop.permute.xlu0 %234 }
 0x18e   : > { %282 = vst.msk [vmem:[%s706_s15 + $0x4] sm:$0x1] %vm230_vm4, %v280_v63  ;;  %322 = vst.msk [vmem:[%s706_s15 + $0x5] sm:$0x1] %vm230_vm4, %v280_v63 }
 0x18f   : > { %338 = vst.msk [vmem:[%s706_s15 + $0x6] sm:$0x1] %vm230_vm4, %v280_v63  ;;  %354 = vst.msk [vmem:[%s706_s15 + $0x7] sm:$0x1] %vm230_vm4, %v280_v63 }
 0x190   : > { %238 = vst.msk [vmem:[%s706_s15] sm:$0x1] %vm237_vm5, %v235_v0  ;;  %315 = vst.msk [vmem:[%s706_s15 + $0x1] sm:$0x1] %vm237_vm5, %v235_v0 }
 0x191   : > { %331 = vst.msk [vmem:[%s706_s15 + $0x2] sm:$0x1] %vm237_vm5, %v235_v0  ;;  %347 = vst.msk [vmem:[%s706_s15 + $0x3] sm:$0x1] %vm237_vm5, %v235_v0  ;;  %v286_v1 = vpop.permute.xlu1 %285  ;;  %v241_v2 = vpop.permute.xlu0 %240 }
 0x192   : > { %288 = vst.msk [vmem:[%s706_s15 + $0x4] sm:$0x1] %vm237_vm5, %v286_v1  ;;  %323 = vst.msk [vmem:[%s706_s15 + $0x5] sm:$0x1] %vm237_vm5, %v286_v1 }
 0x193   : > { %339 = vst.msk [vmem:[%s706_s15 + $0x6] sm:$0x1] %vm237_vm5, %v286_v1  ;;  %355 = vst.msk [vmem:[%s706_s15 + $0x7] sm:$0x1] %vm237_vm5, %v286_v1 }
 0x194   : > { %244 = vst.msk [vmem:[%s706_s15] sm:$0x1] %vm243_vm6, %v241_v2  ;;  %316 = vst.msk [vmem:[%s706_s15 + $0x1] sm:$0x1] %vm243_vm6, %v241_v2 }
 0x195   : > { %332 = vst.msk [vmem:[%s706_s15 + $0x2] sm:$0x1] %vm243_vm6, %v241_v2  ;;  %348 = vst.msk [vmem:[%s706_s15 + $0x3] sm:$0x1] %vm243_vm6, %v241_v2  ;;  %v291_v3 = vpop.permute.xlu1 %290  ;;  %v248_v4 = vpop.permute.xlu0 %247 }
 0x196   : > { %293 = vst.msk [vmem:[%s706_s15 + $0x4] sm:$0x1] %vm243_vm6, %v291_v3  ;;  %324 = vst.msk [vmem:[%s706_s15 + $0x5] sm:$0x1] %vm243_vm6, %v291_v3 }
 0x197   : > { %340 = vst.msk [vmem:[%s706_s15 + $0x6] sm:$0x1] %vm243_vm6, %v291_v3  ;;  %356 = vst.msk [vmem:[%s706_s15 + $0x7] sm:$0x1] %vm243_vm6, %v291_v3 }
 0x198   : > { %251 = vst.msk [vmem:[%s706_s15] sm:$0x1] %vm250_vm7, %v248_v4  ;;  %317 = vst.msk [vmem:[%s706_s15 + $0x1] sm:$0x1] %vm250_vm7, %v248_v4 }
 0x199   : > { %333 = vst.msk [vmem:[%s706_s15 + $0x2] sm:$0x1] %vm250_vm7, %v248_v4  ;;  %349 = vst.msk [vmem:[%s706_s15 + $0x3] sm:$0x1] %vm250_vm7, %v248_v4  ;;  %v297_v5 = vpop.permute.xlu1 %296  ;;  %v255_v6 = vpop.permute.xlu0 %254 }
 0x19a   : > { %299 = vst.msk [vmem:[%s706_s15 + $0x4] sm:$0x1] %vm250_vm7, %v297_v5  ;;  %325 = vst.msk [vmem:[%s706_s15 + $0x5] sm:$0x1] %vm250_vm7, %v297_v5 }
 0x19b   : > { %341 = vst.msk [vmem:[%s706_s15 + $0x6] sm:$0x1] %vm250_vm7, %v297_v5  ;;  %357 = vst.msk [vmem:[%s706_s15 + $0x7] sm:$0x1] %vm250_vm7, %v297_v5 }
 0x19c   : > { %258 = vst.msk [vmem:[%s706_s15] sm:$0x1] %vm257_vm8, %v255_v6  ;;  %318 = vst.msk [vmem:[%s706_s15 + $0x1] sm:$0x1] %vm257_vm8, %v255_v6 }
 0x19d   : > { %334 = vst.msk [vmem:[%s706_s15 + $0x2] sm:$0x1] %vm257_vm8, %v255_v6  ;;  %350 = vst.msk [vmem:[%s706_s15 + $0x3] sm:$0x1] %vm257_vm8, %v255_v6  ;;  %v303_v7 = vpop.permute.xlu1 %302  ;;  %v262_v8 = vpop.permute.xlu0 %261 }
 0x19e   : > { %305 = vst.msk [vmem:[%s706_s15 + $0x4] sm:$0x1] %vm257_vm8, %v303_v7  ;;  %326 = vst.msk [vmem:[%s706_s15 + $0x5] sm:$0x1] %vm257_vm8, %v303_v7 }
 0x19f   : > { %342 = vst.msk [vmem:[%s706_s15 + $0x6] sm:$0x1] %vm257_vm8, %v303_v7  ;;  %358 = vst.msk [vmem:[%s706_s15 + $0x7] sm:$0x1] %vm257_vm8, %v303_v7 }
 0x1a0   : > { %265 = vst.msk [vmem:[%s706_s15] sm:$0x1] %vm264_vm9, %v262_v8  ;;  %319 = vst.msk [vmem:[%s706_s15 + $0x1] sm:$0x1] %vm264_vm9, %v262_v8 }
 0x1a1   : > { %335 = vst.msk [vmem:[%s706_s15 + $0x2] sm:$0x1] %vm264_vm9, %v262_v8  ;;  %351 = vst.msk [vmem:[%s706_s15 + $0x3] sm:$0x1] %vm264_vm9, %v262_v8  ;;  %v309_v9 = vpop.permute.xlu1 %308 }
 0x1a2   : > { %311 = vst.msk [vmem:[%s706_s15 + $0x4] sm:$0x1] %vm264_vm9, %v309_v9  ;;  %327 = vst.msk [vmem:[%s706_s15 + $0x5] sm:$0x1] %vm264_vm9, %v309_v9 }
 0x1a3   : > { %343 = vst.msk [vmem:[%s706_s15 + $0x6] sm:$0x1] %vm264_vm9, %v309_v9  ;;  %359 = vst.msk [vmem:[%s706_s15 + $0x7] sm:$0x1] %vm264_vm9, %v309_v9 }
 0x1a4   : > { %553 = shalt.err (!%p550_p5)
}
 0x1a5   : > { %s554_s28 = scalar_lea.hbm %s825_s22, 128  ;;  %s558_s2 = scalar_lea.hbm %s882_s1, 256 }
 0x1a6   : > { %p555_p6 = scmp.ne.s32.totalorder %s825_s22, %s554_s28  ;;  %p559_p10 = scmp.lt.s32.totalorder %s825_s22, %s882_s1 }
 0x1a7   : > { %p560_p11 = scmp.lt.s32.totalorder %s558_s2, %s554_s28 }
 0x1a8   : > { %p556_p7 = pnand %p555_p6, %p679_p4 }
 0x1a9   : > { %p561_p12 = por %p560_p11, %p559_p10 }
 0x1aa   : > { %p557_p9 = pneg %p556_p7 }
 0x1ac   : > { %p562_p13 = pnand %p561_p12, %p557_p9 }
 0x1ae   : > { %565 = shalt.err (!%p562_p13)
}
 0x1af   : > { %475 = dma.vmem_to_hbm [thread:$0]  (%p679_p4), %s827_s20, 128, %s825_s22, %s361_s23  }
 0x1b0 PF: > { %p481_p0 = scmp.ge.s32.totalorder %s616_s11, 2  ;;  %s389_s5 = sand.u32 1, %s596_s6  }
 0x1b1   : > { %s390_s12 = scalar_lea.sflag [#allocation3], %s389_s5 }
 0x1b2   : > { %p478_p1 = pnand %p481_p0, %p686_p8 }
 0x1b4   : > { %p479_p2 = pneg %p478_p1 }
 0x1b6   : > { %591 = dma.done.wait (%p479_p2), %s390_s12, 128  }
 0x1b7   : > { %593 = vsyncadd (%p479_p2), %s390_s12, 4294967168  ;;  %s14_s11 = sadd.s32 1, %s616_s11   ;;  %s885_s6 = smov %s600_s7 }
 0x1b8   : > { %p11_p3 = scmp.ge.s32.totalorder %s14_s11, 4   ;;  %s886_s7 = smov %s604_s8 }
 0x1b9   : > { %s887_s8 = smov %s692_s19  ;;  %s888_s9 = smov %s612_s10 }
 0x1ba   : > { %s889_s10 = smov %s891_s14  ;;  %13 = sbr.rel (!%p11_p3) target bundleno = 4 (0x4), region = 60 }
 0x1bf   :  { %395 = vsyncpa [#allocation3], 1 }
 0x1c0   :  { %397 = vsyncpa [#allocation3 + $0x1], 1 }

</bundles_post_ra>
